<compile_context>
chip_gen: v7x
topology: tpu7x:2x2x1
jax: 0.10.0
libtpu: 0.0.40
codegen_flags: <defaults>
</compile_context>

<pallas_src>
import jax
import jax.numpy as jnp
from jax.experimental import pallas as pl
from jax.experimental.pallas import tpu as pltpu


def _round_up(x, m):
    return ((x + m - 1) // m) * m


def mlp_kernel(x_ref, wmid_ref, sp_ref, o_ref):
    # x_ref:    (2, tb)   f32, batch on the lane axis
    # wmid_ref: (64, 32)  bf16, rows 0:32 = W2^T, rows 32:64 = W3^T   (out, in)
    # sp_ref:   (32, 8)   f32, packed small params (see pack_params)
    # o_ref:    (1, tb)   f32, lane-dense output tile
    xt = x_ref[...]
    sp = sp_ref[...]

    w1c0 = sp[:, 0:1]     # (32, 1)  W1[0, :] as a column
    w1c1 = sp[:, 1:2]     # (32, 1)  W1[1, :]
    b1 = sp[:, 2:3]       # (32, 1)
    b2 = sp[:, 3:4]
    b3 = sp[:, 4:5]
    w4c = sp[:, 5:6]      # (32, 1)  W4[:, 0]
    b4 = sp[0:1, 6:7]     # (1, 1)

    x0 = xt[0:1, :]       # (1, tb)
    x1 = xt[1:2, :]

    # Layer 1 (K=2): broadcast FMAs on the VPU (a 2-deep matmul would waste the MXU).
    h = jnp.maximum(w1c0 * x0 + w1c1 * x1 + b1, 0.0)                        # (32, tb) f32

    # Layers 2 & 3: (32,32) @ (32,tb) on the MXU. bf16 operands, f32 accumulation:
    # avoids the multi-pass f32 MXU lowering and halves matmul operand traffic.
    w2t = wmid_ref[0:32, :]                                                  # (32, 32) bf16
    w3t = wmid_ref[32:64, :]
    h = jnp.dot(w2t, h.astype(jnp.bfloat16),
                preferred_element_type=jnp.float32) + b2
    h = jnp.maximum(h, 0.0)
    h = jnp.dot(w3t, h.astype(jnp.bfloat16),
                preferred_element_type=jnp.float32) + b3
    h = jnp.maximum(h, 0.0)

    # Layer 4 (out=1): elementwise multiply + sublane reduction (XLU), not the MXU.
    out = jnp.sum(w4c * h, axis=0, keepdims=True) + b4                       # (1, tb)
    o_ref[...] = out.astype(o_ref.dtype)


def pack_params(params):
    """Pack the 8 parameter tensors into two small resident slabs."""
    w1, b1 = params["w1"], params["b1"]   # (2,32),  (32,)
    w2, b2 = params["w2"], params["b2"]   # (32,32), (32,)
    w3, b3 = params["w3"], params["b3"]   # (32,32), (32,)
    w4, b4 = params["w4"], params["b4"]   # (32,1),  (1,)

    # Mid-layer weights, transposed for the (out,in)@(in,tb) dataflow, stored bf16
    # so the MXU sees native bf16 operands (accumulation stays f32 in-kernel).
    w_mid = jnp.concatenate([w2.T, w3.T], axis=0).astype(jnp.bfloat16)       # (64, 32)

    sp = jnp.zeros((32, 8), jnp.float32)
    sp = sp.at[:, 0].set(w1[0, :])
    sp = sp.at[:, 1].set(w1[1, :])
    sp = sp.at[:, 2].set(b1)
    sp = sp.at[:, 3].set(b2)
    sp = sp.at[:, 4].set(b3)
    sp = sp.at[:, 5].set(w4[:, 0])
    sp = sp.at[0, 6].set(b4[0])
    return w_mid, sp


def discriminator_forward(x, params, *, tb=8192):
    """x: (N, 2) float32. Returns (N, 1) float32."""
    N, d_in = x.shape
    assert d_in == 2

    # Lane-dense batch tile: multiple of 128, large default (amortizes the
    # ~0.35 us/grid-step overhead), clamped to the 128-padded batch.
    lanes = _round_up(max(N, 128), 128)
    tb = _round_up(max(128, int(tb)), 128)
    tb = min(tb, lanes)
    # Megacore (v7x has 2 TensorCores): keep >=2 grid steps whenever the batch
    # is big enough, so the "parallel" axis can actually be sharded.
    if lanes // tb < 2 and lanes >= 256:
        tb = _round_up((lanes + 1) // 2, 128)
    n_pad = _round_up(lanes, tb)

    # Batch on lanes. Transpose + (optional) pad are layout plumbing only; they
    # live inside the same jit as the kernel so XLA fuses them, and the pad is
    # skipped when it would be a no-op. (Producing a (2,N) feature-major layout
    # upstream would remove this entirely.)
    xt = jnp.transpose(x.astype(jnp.float32))                                # (2, N)
    if n_pad != N:
        xt = jnp.pad(xt, ((0, 0), (0, n_pad - N)))

    w_mid, sp = pack_params(params)

    compiler_kwargs = dict(dimension_semantics=("parallel",))
    if tb >= 32768:
        # Very large tiles: raise the scoped-VMEM ceiling (default 16/32 MiB),
        # staying under v7x's 64 MiB physical VMEM.
        compiler_kwargs["vmem_limit_bytes"] = 48 << 20

    out_t = pl.pallas_call(
        mlp_kernel,
        out_shape=jax.ShapeDtypeStruct((1, n_pad), jnp.float32),
        grid_spec=pltpu.PrefetchScalarGridSpec(
            num_scalar_prefetch=0,
            grid=(n_pad // tb,),
            in_specs=[
                pl.BlockSpec((2, tb), lambda i: (0, i)),    # x, tiled over batch lanes
                pl.BlockSpec((64, 32), lambda i: (0, 0)),   # packed mid weights (resident, bf16)
                pl.BlockSpec((32, 8), lambda i: (0, 0)),    # packed small params (resident)
            ],
            out_specs=pl.BlockSpec((1, tb), lambda i: (0, i)),
        ),
        compiler_params=pltpu.CompilerParams(**compiler_kwargs),
    )(xt, w_mid, sp)

    return out_t[0, :N][:, None]                                             # (N, 1)


def init_params(key):
    """Deterministic init mimicking nn.Linear's U(-1/sqrt(fan_in), 1/sqrt(fan_in))."""
    dims = [(2, 32), (32, 32), (32, 32), (32, 1)]
    params = {}
    for idx, (fan_in, fan_out) in enumerate(dims, start=1):
        key, kw, kb = jax.random.split(key, 3)
        bound = 1.0 / float(fan_in) ** 0.5
        params[f"w{idx}"] = jax.random.uniform(
            kw, (fan_in, fan_out), jnp.float32, -bound, bound)
        params[f"b{idx}"] = jax.random.uniform(
            kb, (fan_out,), jnp.float32, -bound, bound)
    return params


def reference_forward(x, params):
    """Exact-f32 reference (HIGHEST-precision matmuls)."""
    hi = jax.lax.Precision.HIGHEST
    w1, b1 = params["w1"], params["b1"]
    h = jnp.maximum(x[:, 0:1] * w1[0] + x[:, 1:2] * w1[1] + b1, 0.0)
    h = jnp.maximum(jnp.dot(h, params["w2"], precision=hi) + params["b2"], 0.0)
    h = jnp.maximum(jnp.dot(h, params["w3"], precision=hi) + params["b3"], 0.0)
    return jnp.sum(h * params["w4"][:, 0], axis=1, keepdims=True) + params["b4"]


if __name__ == "__main__":
    key = jax.random.PRNGKey(0)
    kp, kx = jax.random.split(key)
    params = init_params(kp)

    N = 300  # small batch of 2-feature points; exercises padding + multi-step grid
    x = jax.random.normal(kx, (N, 2), jnp.float32)

    ref = jax.block_until_ready(reference_forward(x, params))

    fwd = jax.jit(discriminator_forward, static_argnames=("tb",))

    # Small explicit tile (tb=128 -> 3 grid steps over the padded batch).
    out_small = jax.block_until_ready(fwd(x, params, tb=128))
    # Default large tile; auto-split keeps >=2 grid steps (here tb=256, 2 steps).
    out_default = jax.block_until_ready(fwd(x, params))

    assert out_small.shape == (N, 1) and out_default.shape == (N, 1)
    # Tolerance covers bf16-operand (f32-accumulate) MXU layers in the kernel vs
    # the exact-f32 reference; structural bugs would produce errors >> 1e-1.
    for out in (out_small, out_default):
        err = float(jnp.max(jnp.abs(out - ref)))
        assert err < 2e-2, f"mismatch vs reference (max abs err {err})"

    print("KERNEL_OK")
</pallas_src>

<mosaic_0001>
module attributes {stable_mosaic.version = 11 : i64} {
  func.func @mlp_kernel(%arg0: i32, %arg1: memref<2x128xf32, #tpu.memory_space<vmem>>, %arg2: memref<64x32xbf16, #tpu.memory_space<vmem>>, %arg3: memref<32x8xf32, #tpu.memory_space<vmem>>, %arg4: memref<1x128xf32, #tpu.memory_space<vmem>>) attributes {dimension_semantics = [#tpu.dimension_semantics<parallel>], iteration_bounds = array<i64: 3>, scalar_prefetch = 0 : i64, scratch_operands = 0 : i64, tpu.core_type = #tpu.core_type<tc>, window_params = [{transform_indices = @transform_0, window_bounds = array<i64: 2, 128>}, {pipeline_mode = #tpu.pipeline_mode<synchronous>, transform_indices = @transform_1, window_bounds = array<i64: 64, 32>}, {pipeline_mode = #tpu.pipeline_mode<synchronous>, transform_indices = @transform_2, window_bounds = array<i64: 32, 8>}, {transform_indices = @transform_3, window_bounds = array<i64: 1, 128>}]} {
    %c0 = arith.constant 0 : index
    %c0_0 = arith.constant 0 : index
    %0 = vector.load %arg1[%c0, %c0_0] : memref<2x128xf32, #tpu.memory_space<vmem>>, vector<2x128xf32>
    %c0_1 = arith.constant 0 : index
    %c0_2 = arith.constant 0 : index
    %1 = vector.load %arg3[%c0_1, %c0_2] : memref<32x8xf32, #tpu.memory_space<vmem>>, vector<32x8xf32>
    %2 = vector.extract_strided_slice %1 {offsets = [0, 0], sizes = [32, 1], strides = [1, 1]} : vector<32x8xf32> to vector<32x1xf32>
    %3 = vector.extract_strided_slice %1 {offsets = [0, 1], sizes = [32, 1], strides = [1, 1]} : vector<32x8xf32> to vector<32x1xf32>
    %4 = vector.extract_strided_slice %1 {offsets = [0, 2], sizes = [32, 1], strides = [1, 1]} : vector<32x8xf32> to vector<32x1xf32>
    %5 = vector.extract_strided_slice %1 {offsets = [0, 3], sizes = [32, 1], strides = [1, 1]} : vector<32x8xf32> to vector<32x1xf32>
    %6 = vector.extract_strided_slice %1 {offsets = [0, 4], sizes = [32, 1], strides = [1, 1]} : vector<32x8xf32> to vector<32x1xf32>
    %7 = vector.extract_strided_slice %1 {offsets = [0, 5], sizes = [32, 1], strides = [1, 1]} : vector<32x8xf32> to vector<32x1xf32>
    %8 = vector.extract_strided_slice %1 {offsets = [0, 6], sizes = [1, 1], strides = [1, 1]} : vector<32x8xf32> to vector<1x1xf32>
    %9 = vector.extract_strided_slice %0 {offsets = [0, 0], sizes = [1, 128], strides = [1, 1]} : vector<2x128xf32> to vector<1x128xf32>
    %10 = vector.extract_strided_slice %0 {offsets = [1, 0], sizes = [1, 128], strides = [1, 1]} : vector<2x128xf32> to vector<1x128xf32>
    %11 = vector.broadcast %2 : vector<32x1xf32> to vector<32x128xf32>
    %12 = vector.broadcast %9 : vector<1x128xf32> to vector<32x128xf32>
    %13 = arith.mulf %11, %12 : vector<32x128xf32>
    %14 = vector.broadcast %3 : vector<32x1xf32> to vector<32x128xf32>
    %15 = vector.broadcast %10 : vector<1x128xf32> to vector<32x128xf32>
    %16 = arith.mulf %14, %15 : vector<32x128xf32>
    %17 = arith.addf %13, %16 : vector<32x128xf32>
    %18 = vector.broadcast %4 : vector<32x1xf32> to vector<32x128xf32>
    %19 = arith.addf %17, %18 : vector<32x128xf32>
    %cst = arith.constant 0.000000e+00 : f32
    %20 = vector.broadcast %cst : f32 to vector<32x128xf32>
    %21 = arith.maximumf %19, %20 : vector<32x128xf32>
    %c0_3 = arith.constant 0 : index
    %c0_4 = arith.constant 0 : index
    %22 = vector.load %arg2[%c0_3, %c0_4] : memref<64x32xbf16, #tpu.memory_space<vmem>>, vector<32x32xbf16>
    %c32 = arith.constant 32 : index
    %c0_5 = arith.constant 0 : index
    %23 = vector.load %arg2[%c32, %c0_5] : memref<64x32xbf16, #tpu.memory_space<vmem>>, vector<32x32xbf16>
    %24 = arith.truncf %21 : vector<32x128xf32> to vector<32x128xbf16>
    %cst_6 = arith.constant dense<0.000000e+00> : vector<32x128xf32>
    %25 = tpu.matmul %22, %24, %cst_6 {dimension_numbers = #tpu.dot_dimension_numbers<[1], [0], [0], [1], [0, 0, 1, 1], [], []>} : vector<32x32xbf16>, vector<32x128xbf16>, vector<32x128xf32> -> vector<32x128xf32>
    %26 = vector.broadcast %5 : vector<32x1xf32> to vector<32x128xf32>
    %27 = arith.addf %25, %26 : vector<32x128xf32>
    %cst_7 = arith.constant 0.000000e+00 : f32
    %28 = vector.broadcast %cst_7 : f32 to vector<32x128xf32>
    %29 = arith.maximumf %27, %28 : vector<32x128xf32>
    %30 = arith.truncf %29 : vector<32x128xf32> to vector<32x128xbf16>
    %cst_8 = arith.constant dense<0.000000e+00> : vector<32x128xf32>
    %31 = tpu.matmul %23, %30, %cst_8 {dimension_numbers = #tpu.dot_dimension_numbers<[1], [0], [0], [1], [0, 0, 1, 1], [], []>} : vector<32x32xbf16>, vector<32x128xbf16>, vector<32x128xf32> -> vector<32x128xf32>
    %32 = vector.broadcast %6 : vector<32x1xf32> to vector<32x128xf32>
    %33 = arith.addf %31, %32 : vector<32x128xf32>
    %cst_9 = arith.constant 0.000000e+00 : f32
    %34 = vector.broadcast %cst_9 : f32 to vector<32x128xf32>
    %35 = arith.maximumf %33, %34 : vector<32x128xf32>
    %36 = vector.broadcast %7 : vector<32x1xf32> to vector<32x128xf32>
    %37 = arith.mulf %36, %35 : vector<32x128xf32>
    %cst_10 = arith.constant dense<0.000000e+00> : vector<128xf32>
    %38 = vector.multi_reduction <add>, %37, %cst_10 [0] : vector<32x128xf32> to vector<128xf32>
    %39 = vector.shape_cast %38 : vector<128xf32> to vector<1x128xf32>
    %40 = vector.broadcast %8 : vector<1x1xf32> to vector<1x128xf32>
    %41 = arith.addf %39, %40 : vector<1x128xf32>
    %c0_11 = arith.constant 0 : index
    %c0_12 = arith.constant 0 : index
    %42 = vector.load %arg4[%c0_11, %c0_12] : memref<1x128xf32, #tpu.memory_space<vmem>>, vector<1x128xf32>
    tpu.vector_store %arg4[%c0_11, %c0_12], %41 {strides = array<i32>} : memref<1x128xf32, #tpu.memory_space<vmem>>, vector<1x128xf32>,
    return
  }
  func.func @transform_0(%arg0: i32) -> (i32, i32) {
    %c0_i32 = arith.constant 0 : i32
    %c0_i32_0 = arith.constant 0 : i32
    return %c0_i32, %arg0 : i32, i32
  }
  func.func @transform_1(%arg0: i32) -> (i32, i32) {
    %c0_i32 = arith.constant 0 : i32
    %c0_i32_0 = arith.constant 0 : i32
    %c0_i32_1 = arith.constant 0 : i32
    return %c0_i32, %c0_i32_0 : i32, i32
  }
  func.func @transform_2(%arg0: i32) -> (i32, i32) {
    %c0_i32 = arith.constant 0 : i32
    %c0_i32_0 = arith.constant 0 : i32
    %c0_i32_1 = arith.constant 0 : i32
    return %c0_i32, %c0_i32_0 : i32, i32
  }
  func.func @transform_3(%arg0: i32) -> (i32, i32) {
    %c0_i32 = arith.constant 0 : i32
    %c0_i32_0 = arith.constant 0 : i32
    return %c0_i32, %arg0 : i32, i32
  }
}

</mosaic_0001>

<bundles_post_ra>
// kernel: discriminator_forward.1
= control target key start
LH: loop header
LB: loop body
LE: loop exit
PB: predicated region body
PF: predicated region fallthrough
CT: control target
= control target key end

     0   :  { %s624_s12 = smov 0   ;;  %s710_s0 = inlined_call_operand.vmem [shape: f32[2,384], index: 0, kind: input, shape index: {}]   ;;  %s711_s1 = inlined_call_operand.vmem [shape: bf16[64,32], index: 1, kind: input, shape index: {}]   ;;  %s712_s2 = inlined_call_operand.vmem [shape: f32[32,8], index: 2, kind: input, shape index: {}]   ;;  %s713_s3 = inlined_call_operand.vmem [shape: f32[1,384], index: 3, kind: output, shape index: {}]  }
   0x1 LB: > { %s515_s13 = sadd.s32 4294967295, %s595_s12   ;;  %p519_p0 = scmp.ge.s32.totalorder %s595_s12, 1  ;;  %s595_s12 = sphi %s624_s12, %s13_s12  }
   0x2   : > { %p136_p1 = scmp.lt.s32.totalorder %s595_s12, 4 }
   0x4   : > { %p137_p2 = pnand %p519_p0, %p136_p1 }
   0x5   : > { %v635_v0 = vld [vmem:[%s712_s2] sm:$0xff] (!%p137_p2)  ;;  %v597_v1 = vmov (!%p137_p2), 1   ;;  %v598_v2 = vmov (!%p137_p2), 0   ;;  %v642_v3 = vld [vmem:[%s712_s2 + $0x8] sm:$0xff] (!%p137_p2)  ;;  %v649_v4 = vld [vmem:[%s712_s2 + $0x10] sm:$0xff] (!%p137_p2)  ;;  %v599_v6 = vmov (!%p137_p2), 2   ;;  %v190_v9 = vlaneseq (!%p137_p2) }
   0x6   : > { %140 = sbr.rel (%p137_p2) target bundleno = 643 (0x283), region = 32  ;;  %571 = vset.pattern.permute.xlu1 (!%p137_p2), %v597_v1  ;;  %570 = vset.pattern.permute.xlu0 (!%p137_p2), %v598_v2  ;;  %v654_v5 = vld [vmem:[%s712_s2 + $0x18] sm:$0xff] (!%p137_p2)  ;;  %v585_v7 = vld [vmem:[%s711_s1] sm:$0xff] (!%p137_p2)   ;;  %vm286_vm0 = vcmask (!%p137_p2), 261120   ;;  %v600_v8 = vmov (!%p137_p2), 3   ;;  %p157_p3 = scmp.lt.s32.totalorder (!%p137_p2), %s515_s13, 2 }
   0x7   : > { %199 = vperm.xlu1 (!%p137_p2), %571, %v635_v0   ;;  %172 = vperm.xlu0 (!%p137_p2), %570, %v635_v0   ;;  %v191_v12 = vshrl.u32 (!%p137_p2), %v190_v9, 7  ;;  %v586_v50 = vld [vmem:[%s711_s1 + $0x8] sm:$0xff] (!%p137_p2)   ;;  %v587_v51 = vld [vmem:[%s711_s1 + $0x10] sm:$0xff] (!%p137_p2)   ;;  %v601_v52 = vmov (!%p137_p2), 4   ;;  %v602_v53 = vmov (!%p137_p2), 5   ;;  %v603_v54 = vmov (!%p137_p2), 6  }
   0x8   : > { %543 = vmatprep.mubr.msk.bf16.mxu0 (!%p137_p2), %vm286_vm0, %v585_v7  ;;  %551 = vmatprep.mubr.msk.bf16.mxu1 (!%p137_p2), %vm286_vm0, %v587_v51 }
   0x9   : > { %v216_v15 = vsub.s32 (!%p137_p2), 1, %v191_v12  ;;  %v192_v16 = vsub.s32 (!%p137_p2), 0, %v191_v12 }
   0xb   : > { %203 = vperm.xlu1 (!%p137_p2), %571, %v642_v3   ;;  %177 = vperm.xlu0 (!%p137_p2), %570, %v642_v3  }
   0xd   : > { %s715_s13 = smov (!%p157_p3, %s515_s13), 2 }
   0xe   : > { %s520_s24 = sshll.u32 %s715_s13, 1  ;;  %s163_s9 = scalar_lea.vmem %s713_s3, %s715_s13 }
   0xf   : > { %572 = vset.pattern.permute.xlu1 %v598_v2  ;;  %182 = vperm.xlu0 %570, %v649_v4   ;;  %s160_s27 = scalar_lea.vmem %s710_s0, %s520_s24 }
  0x10   : > { %187 = vperm.xlu1 %572, %v654_v5   ;;  %v165_v17 = vld [vmem:[%s160_s27] sm:$0x3] }
  0x11   : > { %v217_v20 = vrot.slane %v165_v17, %v216_v15  ;;  %v193_v21 = vrot.slane %v165_v17, %v192_v16 }
  0x13   : > { %573 = vset.pattern.permute.xlu0 %v597_v1 }
  0x14   : > { %574 = vset.pattern.permute.xlu1 %v597_v1  ;;  %207 = vperm.xlu0 %573, %v649_v4  }
  0x15   : > { %211 = vperm.xlu1 %574, %v654_v5  }
  0x18   : > { %576 = vset.pattern.permute.xlu0 %v599_v6 }
  0x19   : > { %575 = vset.pattern.permute.xlu1 %v599_v6  ;;  %231 = vperm.xlu0 %576, %v642_v3  }
  0x1a   : > { %227 = vperm.xlu1 %575, %v635_v0  }
  0x1d   : > { %577 = vset.pattern.permute.xlu0 %v600_v8 }
  0x1e   : > { %235 = vperm.xlu1 %575, %v649_v4   ;;  %261 = vperm.xlu0 %577, %v635_v0  }
  0x22   : > { %239 = vperm.xlu1 %575, %v654_v5   ;;  %273 = vperm.xlu0 %577, %v654_v5  }
  0x26   : > { %578 = vset.pattern.permute.xlu1 %v600_v8  ;;  %580 = vset.pattern.permute.xlu0 %v601_v52 }
  0x27   : > { %265 = vperm.xlu1 %578, %v642_v3   ;;  %353 = vperm.xlu0 %580, %v642_v3  }
  0x2b   : > { %269 = vperm.xlu1 %578, %v649_v4   ;;  %581 = vset.pattern.permute.xlu0 %v602_v53 }
  0x2c   : > { %434 = vperm.xlu0 %581, %v635_v0  }
  0x2f   : > { %579 = vset.pattern.permute.xlu1 %v601_v52 }
  0x30   : > { %349 = vperm.xlu1 %579, %v635_v0   ;;  %446 = vperm.xlu0 %581, %v654_v5  }
  0x34   : > { %357 = vperm.xlu1 %579, %v649_v4   ;;  %584 = vset.pattern.permute.xlu0 %v603_v54 }
  0x38   : > { %361 = vperm.xlu1 %579, %v654_v5  }
  0x3c   : > { %582 = vset.pattern.permute.xlu1 %v602_v53 }
  0x3d   : > { %438 = vperm.xlu1 %582, %v642_v3  }
  0x41   : > { %442 = vperm.xlu1 %582, %v649_v4  }
  0x45   : > { %583 = vset.pattern.permute.xlu1 %v603_v54 }
  0x46   : > { %463 = vperm.xlu1 %583, %v635_v0   ;;  %v588_v0 = vld [vmem:[%s711_s1 + $0x18] sm:$0xff]  }
  0x86   : > { %v200_v10 = vpop.permute.xlu1 %199  ;;  %v173_v11 = vpop.permute.xlu0 %172 }
  0x87   : > { %v218_v25 = vmul.f32 %v217_v20, %v200_v10  ;;  %v194_v26 = vmul.f32 %v193_v21, %v173_v11 }
  0x89   : > { %v222_v30 = vadd.f32 %v218_v25, %v194_v26 }
  0x8a   : > { %v204_v13 = vpop.permute.xlu1 %203  ;;  %v178_v14 = vpop.permute.xlu0 %177 }
  0x8b   : > { %v219_v22 = vmul.f32 %v217_v20, %v204_v13  ;;  %v195_v23 = vmul.f32 %v193_v21, %v178_v14 }
  0x8d   : > { %v223_v28 = vadd.f32 %v219_v22, %v195_v23 }
  0x8e   : > { %v183_v18 = vpop.permute.xlu0 %182 }
  0x8f   : > { %v188_v19 = vpop.permute.xlu1 %187  ;;  %v196_v36 = vmul.f32 %v193_v21, %v183_v18 }
  0x90   : > { %v197_v40 = vmul.f32 %v193_v21, %v188_v19 }
  0x93   : > { %v208_v24 = vpop.permute.xlu0 %207 }
  0x94   : > { %v212_v27 = vpop.permute.xlu1 %211  ;;  %v220_v33 = vmul.f32 %v217_v20, %v208_v24 }
  0x95   : > { %v221_v37 = vmul.f32 %v217_v20, %v212_v27 }
  0x96   : > { %v224_v41 = vadd.f32 %v220_v33, %v196_v36 }
  0x97   : > { %v225_v44 = vadd.f32 %v221_v37, %v197_v40 }
  0x98   : > { %v232_v29 = vpop.permute.xlu0 %231 }
  0x99   : > { %v243_v31 = vadd.f32 %v232_v29, %v223_v28  ;;  %v228_v32 = vpop.permute.xlu1 %227 }
  0x9a   : > { %v242_v34 = vadd.f32 %v228_v32, %v222_v30 }
  0x9b   : > { %v247_v35 = vmax.f32 %v243_v31, 0.0 }
  0x9c   : > { %v246_v38 = vmax.f32 %v242_v34, 0.0 }
  0x9d   : > { %v236_v39 = vpop.permute.xlu1 %235  ;;  %v262_v56 = vpop.permute.xlu0 %261 }
  0x9e   : > { %v258_v42 = vpack.c.bf16 %v247_v35, %v246_v38  ;;  %v244_v43 = vadd.f32 %v236_v39, %v224_v41 }
  0xa0   : > { %539 = vmatprep.subr.bf16.mxu0 %v258_v42  ;;  %v248_v47 = vmax.f32 %v244_v43, 0.0 }
  0xa1   : > { %v240_v45 = vpop.permute.xlu1 %239  ;;  %540 = vmatpush3.bf16.msra.mxu0 %v258_v42  ;;  %v274_v59 = vpop.permute.xlu0 %273 }
  0xa2   : > { %v245_v46 = vadd.f32 %v240_v45, %v225_v44 }
  0xa4   : > { %v249_v48 = vmax.f32 %v245_v46, 0.0 }
  0xa6   : > { %v259_v49 = vpack.c.bf16 %v249_v48, %v248_v47  ;;  %v266_v55 = vpop.permute.xlu1 %265  ;;  %v354_v13 = vpop.permute.xlu0 %353 }
  0xa8   : > { %541 = vmatprep.subr.bf16.mxu0 %v259_v49 }
  0xa9   : > { %542 = vmatpush3.bf16.msra.mxu0 %v259_v49 }
  0xaa   : > { %v270_v57 = vpop.permute.xlu1 %269 }
  0xab   : > { %v435_v20 = vpop.permute.xlu0 %434 }
  0xac   : > { %544 = vmatmul.mubr.msk.bf16.vlgmr.msra.gmra.mrb[0].mxu0 %vm286_vm0, %v586_v50 }
  0xaf   : > { %v350_v10 = vpop.permute.xlu1 %349  ;;  %v447_v31 = vpop.permute.xlu0 %446 }
  0xb3   : > { %v358_v11 = vpop.permute.xlu1 %357 }
  0xb7   : > { %v362_v12 = vpop.permute.xlu1 %361 }
  0xbc   : > { %v439_v15 = vpop.permute.xlu1 %438 }
  0xc0   : > { %v443_v27 = vpop.permute.xlu1 %442 }
  0xc5   : > { %v464_v42 = vpop.permute.xlu1 %463 }
 0x17f   : > { %v545_v58 = vpop.f32.mrb[0].mxu0 }
 0x180   : > { %v336_v60 = vadd.f32 %v545_v58, %v270_v57  ;;  %v327_v61 = vpop.f32.mrb[1].mxu0 }
 0x181   : > { %v328_v62 = vadd.f32 %v327_v61, %v262_v56  ;;  %v546_v63 = vpop.f32.mrb[2].mxu0 }
 0x182   : > { %v339_v1 = vadd.f32 %v546_v63, %v274_v59  ;;  %v330_v2 = vpop.f32.mrb[3].mxu0  ;;  %v344_v3 = vmax.f32 %v336_v60, 0.0 }
 0x183   : > { %v331_v5 = vadd.f32 %v330_v2, %v266_v55  ;;  %v342_v7 = vmax.f32 %v328_v62, 0.0 }
 0x184   : > { %v345_v6 = vmax.f32 %v339_v1, 0.0 }
 0x185   : > { %v343_v8 = vmax.f32 %v331_v5, 0.0 }
 0x186   : > { %v347_v4 = vpack.c.bf16 %v345_v6, %v344_v3 }
 0x187   : > { %v346_v9 = vpack.c.bf16 %v343_v8, %v342_v7 }
 0x189   : > { %547 = vmatprep.subr.bf16.mxu1 %v346_v9 }
 0x18a   : > { %548 = vmatpush3.bf16.msra.mxu1 %v346_v9 }
 0x18b   : > { %549 = vmatprep.subr.bf16.mxu1 %v347_v4 }
 0x18e   : > { %550 = vmatpush3.bf16.msra.mxu1 %v347_v4 }
 0x191   : > { %552 = vmatmul.mubr.msk.bf16.vlgmr.msra.gmra.mrb[0].mxu1 %vm286_vm0, %v588_v0 }
 0x264   : > { %v553_v14 = vpop.f32.mrb[0].mxu1 }
 0x265   : > { %v414_v16 = vpop.f32.mrb[1].mxu1  ;;  %v423_v17 = vadd.f32 %v553_v14, %v358_v11 }
 0x266   : > { %v415_v18 = vadd.f32 %v414_v16, %v350_v10  ;;  %v554_v19 = vpop.f32.mrb[2].mxu1 }
 0x267   : > { %v417_v21 = vpop.f32.mrb[3].mxu1  ;;  %v426_v23 = vadd.f32 %v554_v19, %v362_v12  ;;  %v431_v25 = vmax.f32 %v423_v17, 0.0 }
 0x268   : > { %v429_v22 = vmax.f32 %v415_v18, 0.0  ;;  %v418_v24 = vadd.f32 %v417_v21, %v354_v13 }
 0x269   : > { %v432_v29 = vmax.f32 %v426_v23, 0.0  ;;  %v451_v32 = vmul.f32 %v443_v27, %v431_v25 }
 0x26a   : > { %v430_v26 = vmax.f32 %v418_v24, 0.0  ;;  %v449_v28 = vmul.f32 %v435_v20, %v429_v22 }
 0x26b   : > { %v452_v35 = vmul.f32 %v447_v31, %v432_v29 }
 0x26c   : > { %v450_v30 = vmul.f32 %v439_v15, %v430_v26 }
 0x26e   : > { %v453_v33 = vadd.f32 %v450_v30, %v449_v28 }
 0x270   : > { %v454_v34 = vadd.f32 %v453_v33, %v451_v32 }
 0x272   : > { %v455_v36 = vadd.f32 %v454_v34, %v452_v35 }
 0x274   : > { %v456_v37 = vrot.slane %v455_v36, 4 }
 0x276   : > { %v457_v38 = vadd.f32 %v456_v37, %v455_v36 }
 0x278   : > { %v458_v39 = vrot.slane %v457_v38, 2 }
 0x27a   : > { %v459_v40 = vadd.f32 %v458_v39, %v457_v38 }
 0x27c   : > { %v460_v41 = vrot.slane %v459_v40, 1 }
 0x27e   : > { %v461_v43 = vadd.f32 %v460_v41, %v459_v40 }
 0x280   : > { %v466_v44 = vadd.f32 %v464_v42, %v461_v43 }
 0x282   : > { %467 = vst [vmem:[%s163_s9] sm:$0x1] %v466_v44 }
 0x283 PF: > { %s13_s12 = sadd.s32 1, %s595_s12  }
 0x284   : > { %p10_p4 = scmp.ge.s32.totalorder %s13_s12, 5  }
 0x286   :  { %12 = sbr.rel (!%p10_p4) target bundleno = 1 (0x1), region = 62 }

</bundles_post_ra>
